<compile_context>
chip_gen: v7x
topology: tpu7x:2x2x1
jax: 0.10.0
libtpu: 0.0.40
codegen_flags: <defaults>
</compile_context>

<pallas_src>
import jax
import jax.numpy as jnp
from jax.experimental import pallas as pl
from jax.experimental.pallas import tpu as pltpu


def _embed_kernel(patches_ref, w_ref, pos_ref, out_ref):
    # patches_ref: (TN, K) bf16   w_ref: (K, D) bf16   pos_ref: (TN, D) bf16
    # out_ref: (TN, D) out_dtype
    acc = jnp.dot(patches_ref[...], w_ref[...],
                  preferred_element_type=jnp.float32)           # MXU, f32 accum
    out_ref[...] = (acc + pos_ref[...].astype(jnp.float32)).astype(out_ref.dtype)


def siglip_vision_embeddings(pixel_values, conv_weight, conv_bias, pos_embed,
                             patch_size, *, tile_n=512,
                             compute_dtype=jnp.bfloat16, out_dtype=None):
    """pixel_values: (B, C, H, W) float32 (NCHW, same as PyTorch).
    conv_weight: (D, C, P, P), conv_bias: (D,), pos_embed: (num_patches, D).
    Returns (B, num_patches, D) in `out_dtype` (default bf16)."""
    B, C, H, W = pixel_values.shape
    D = conv_weight.shape[0]
    P = patch_size
    Hp, Wp = H // P, W // P
    N = Hp * Wp                       # num_patches
    K = C * P * P
    if out_dtype is None:
        out_dtype = compute_dtype     # bf16 activations: halves the out stream

    # --- glue: cast first (half the transpose bytes), then extract patches ---
    # (B, C, Hp, P, Wp, P) -> (B, Hp, Wp, C, P, P) -> (B, N, C*P*P)
    x = pixel_values.astype(compute_dtype)
    patches = x.reshape(B, C, Hp, P, Wp, P)
    patches = jnp.transpose(patches, (0, 2, 4, 1, 3, 5)).reshape(B, N, K)

    # Conv2d weight (D, C, P, P) -> (K, D); inner (c, kh, kw) order matches
    # the patch (c, ph, pw) flatten. No K padding needed: block dims that
    # equal the full array dims bypass the (8,128) constraint.
    w_flat = conv_weight.reshape(D, K).T.astype(compute_dtype)

    # Fold the conv bias into the position embedding exactly in f32, store bf16.
    pos_plus_bias = (pos_embed.astype(jnp.float32)
                     + conv_bias.astype(jnp.float32)[None, :]).astype(compute_dtype)

    # N-tile: multiple of 8 (or the full axis for small N). Partial boundary
    # tiles are handled by Pallas (OOB output rows discarded).
    TN = N if N <= tile_n else tile_n
    n_tiles = pl.cdiv(N, TN)
    # v7x megacore balance: both grid axes are "parallel"; prefer an even
    # total step count so the two TensorCores split work evenly (no-op on
    # single-TC v5e/v6e).
    if (n_tiles * B) % 2 == 1 and TN > 8 and TN % 16 == 0:
        tn_half = TN // 2
        if (pl.cdiv(N, tn_half) * B) % 2 == 0:
            TN = tn_half
            n_tiles = pl.cdiv(N, TN)
    grid = (n_tiles, B)               # n outer, b inner -> pos tile resident

    cbytes = jnp.dtype(compute_dtype).itemsize
    obytes = jnp.dtype(out_dtype).itemsize
    # Resident-set estimate: double-buffered inputs/outputs + f32 acc.
    vmem_est = (2 * K * D * cbytes        # weight (resident)
                + 2 * TN * K * cbytes     # patch tile
                + 2 * TN * D * cbytes     # pos tile (bf16)
                + 2 * TN * D * obytes     # out tile
                + TN * D * 4)             # f32 accumulator intermediate
    vmem_limit = max(int(vmem_est) + (4 << 20), 32 << 20)

    cost = pl.CostEstimate(
        flops=2 * B * N * K * D,
        transcendentals=0,
        bytes_accessed=int(B * N * K * cbytes + K * D * cbytes
                           + N * D * cbytes + B * N * D * obytes))

    out = pl.pallas_call(
        _embed_kernel,
        out_shape=jax.ShapeDtypeStruct((B, N, D), out_dtype),
        grid_spec=pltpu.PrefetchScalarGridSpec(
            num_scalar_prefetch=0,
            grid=grid,
            in_specs=[
                pl.BlockSpec((pl.Squeezed(), TN, K), lambda n, b: (b, n, 0)),
                pl.BlockSpec((K, D), lambda n, b: (0, 0)),   # W resident
                pl.BlockSpec((TN, D), lambda n, b: (n, 0)),  # pos(+bias), b-invariant
            ],
            out_specs=pl.BlockSpec((pl.Squeezed(), TN, D),
                                   lambda n, b: (b, n, 0)),
        ),
        compiler_params=pltpu.CompilerParams(
            dimension_semantics=("parallel", "parallel"),
            vmem_limit_bytes=int(vmem_limit)),
        cost_estimate=cost,
    )(patches, w_flat, pos_plus_bias)
    return out


if __name__ == "__main__":
    # Small config consistent with the module:
    #   num_channels=3, image_size=16, patch_size=4 -> num_patches=16
    #   hidden_size (embed_dim) = 32, batch = 2
    B, C, IMG, P, D = 2, 3, 16, 4, 32
    N = (IMG // P) ** 2

    key = jax.random.PRNGKey(0)
    k_x, k_w, k_b, k_pos = jax.random.split(key, 4)

    pixel_values = jax.random.normal(k_x, (B, C, IMG, IMG), dtype=jnp.float32)
    conv_weight = jax.random.normal(k_w, (D, C, P, P), dtype=jnp.float32) * 0.02
    conv_bias = jax.random.normal(k_b, (D,), dtype=jnp.float32) * 0.02
    pos_embed = jax.random.normal(k_pos, (N, D), dtype=jnp.float32) * 0.02

    out = siglip_vision_embeddings(pixel_values, conv_weight, conv_bias,
                                   pos_embed, patch_size=P)
    out = jax.block_until_ready(out)

    # Reference check in plain JAX (same math as the PyTorch forward, f32).
    ref = jax.lax.conv_general_dilated(
        pixel_values, conv_weight, window_strides=(P, P), padding="VALID",
        dimension_numbers=("NCHW", "OIHW", "NCHW"))
    ref = ref + conv_bias[None, :, None, None]
    ref = ref.reshape(B, D, N).transpose(0, 2, 1) + pos_embed[None]
    assert out.shape == (B, N, D)
    # bf16 inputs / bf16 pos / bf16 output with f32 accumulation -> loose tol.
    assert jnp.allclose(out.astype(jnp.float32), ref, atol=2e-2, rtol=2e-2)

    print("KERNEL_OK")
</pallas_src>

<mosaic_0001>
module attributes {stable_mosaic.version = 11 : i64} {
  func.func @_embed_kernel(%arg0: i32, %arg1: i32, %arg2: memref<1x16x48xbf16, #tpu.memory_space<vmem>>, %arg3: memref<48x32xbf16, #tpu.memory_space<vmem>>, %arg4: memref<16x32xbf16, #tpu.memory_space<vmem>>, %arg5: memref<1x16x32xbf16, #tpu.memory_space<vmem>>) attributes {dimension_semantics = [#tpu.dimension_semantics<parallel>, #tpu.dimension_semantics<parallel>], iteration_bounds = array<i64: 1, 2>, scalar_prefetch = 0 : i64, scratch_operands = 0 : i64, tpu.core_type = #tpu.core_type<tc>, window_params = [{transform_indices = @transform_0, window_bounds = array<i64: 1, 16, 48>}, {pipeline_mode = #tpu.pipeline_mode<synchronous>, transform_indices = @transform_1, window_bounds = array<i64: 48, 32>}, {transform_indices = @transform_2, window_bounds = array<i64: 16, 32>}, {transform_indices = @transform_3, window_bounds = array<i64: 1, 16, 32>}]} {
    %c0 = arith.constant 0 : index
    %c0_0 = arith.constant 0 : index
    %c0_1 = arith.constant 0 : index
    %0 = vector.load %arg2[%c0, %c0_0, %c0_1] : memref<1x16x48xbf16, #tpu.memory_space<vmem>>, vector<1x16x48xbf16>
    %1 = vector.shape_cast %0 : vector<1x16x48xbf16> to vector<16x48xbf16>
    %c0_2 = arith.constant 0 : index
    %c0_3 = arith.constant 0 : index
    %2 = vector.load %arg3[%c0_2, %c0_3] : memref<48x32xbf16, #tpu.memory_space<vmem>>, vector<48x32xbf16>
    %cst = arith.constant dense<0.000000e+00> : vector<16x32xf32>
    %3 = tpu.matmul %1, %2, %cst {dimension_numbers = #tpu.dot_dimension_numbers<[1], [0], [0], [1], [0, 0, 1, 1], [], []>} : vector<16x48xbf16>, vector<48x32xbf16>, vector<16x32xf32> -> vector<16x32xf32>
    %c0_4 = arith.constant 0 : index
    %c0_5 = arith.constant 0 : index
    %4 = vector.load %arg4[%c0_4, %c0_5] : memref<16x32xbf16, #tpu.memory_space<vmem>>, vector<16x32xbf16>
    %5 = arith.extf %4 : vector<16x32xbf16> to vector<16x32xf32>
    %6 = arith.addf %3, %5 : vector<16x32xf32>
    %7 = arith.truncf %6 : vector<16x32xf32> to vector<16x32xbf16>
    %c0_6 = arith.constant 0 : index
    %c0_7 = arith.constant 0 : index
    %c0_8 = arith.constant 0 : index
    %8 = vector.load %arg5[%c0_6, %c0_7, %c0_8] : memref<1x16x32xbf16, #tpu.memory_space<vmem>>, vector<1x16x32xbf16>
    %9 = vector.shape_cast %8 : vector<1x16x32xbf16> to vector<16x32xbf16>
    %10 = vector.shape_cast %7 : vector<16x32xbf16> to vector<1x16x32xbf16>
    tpu.vector_store %arg5[%c0_6, %c0_7, %c0_8], %10 {strides = array<i32>} : memref<1x16x32xbf16, #tpu.memory_space<vmem>>, vector<1x16x32xbf16>,
    return
  }
  func.func @transform_0(%arg0: i32, %arg1: i32) -> (i32, i32, i32) {
    %c0_i32 = arith.constant 0 : i32
    %c0_i32_0 = arith.constant 0 : i32
    return %arg1, %arg0, %c0_i32 : i32, i32, i32
  }
  func.func @transform_1(%arg0: i32, %arg1: i32) -> (i32, i32) {
    %c0_i32 = arith.constant 0 : i32
    %c0_i32_0 = arith.constant 0 : i32
    %c0_i32_1 = arith.constant 0 : i32
    return %c0_i32, %c0_i32_0 : i32, i32
  }
  func.func @transform_2(%arg0: i32, %arg1: i32) -> (i32, i32) {
    %c0_i32 = arith.constant 0 : i32
    %c0_i32_0 = arith.constant 0 : i32
    return %arg0, %c0_i32 : i32, i32
  }
  func.func @transform_3(%arg0: i32, %arg1: i32) -> (i32, i32, i32) {
    %c0_i32 = arith.constant 0 : i32
    %c0_i32_0 = arith.constant 0 : i32
    return %arg1, %arg0, %c0_i32 : i32, i32, i32
  }
}

</mosaic_0001>

<bundles_post_ra>
// kernel: tpu_custom_call.1
= control target key start
LH: loop header
LB: loop body
LE: loop exit
PB: predicated region body
PF: predicated region fallthrough
CT: control target
= control target key end

     0   :  { %8 = vsyncpa [#allocation3], 0  ;;  %s762_s0 = inlined_call_operand.vmem [shape: bf16[2,16,48], index: 0, kind: input, shape index: {}]   ;;  %s763_s1 = inlined_call_operand.vmem [shape: bf16[48,32], index: 1, kind: input, shape index: {}]   ;;  %s764_s2 = inlined_call_operand.vmem [shape: bf16[16,32], index: 2, kind: input, shape index: {}]   ;;  %s765_s3 = inlined_call_operand.hbm [shape: bf16[2,16,32], index: 3, kind: output, shape index: {}]  }
   0x1   :  { %10 = vsyncpa [#allocation3 + $0x1], 0  ;;  %s635_s12 = smov 0   ;;  %s637_s13 = smov 0  }
   0x2   :  { %s639_s14 = smov 0   ;;  %s641_s15 = smov 0  }
   0x3   :  { %s643_s16 = smov 0   ;;  %s645_s17 = smov 0  }
   0x4 LB: > { %s424_s18 = sadd.s32 4294967295, %s608_s17   ;;  %s425_s19 = sadd.s32 4294967294, %s608_s17   ;;  %s608_s17 = sphi %s645_s17, %s16_s17   ;;  %s604_s16 = sphi %s643_s16, %s772_s16   ;;  %s600_s15 = sphi %s641_s15, %s771_s15   ;;  %s596_s14 = sphi %s639_s14, %s770_s14   ;;  %s592_s13 = sphi %s637_s13, %s769_s13   ;;  %s588_s12 = sphi %s635_s12, %s768_s12  }
   0x5   : > { %s25_s20 = sadd.s32 1, %s604_s16  ;;  %s112_s21 = sadd.s32 1, %s596_s14 }
   0x6   : > { %p26_p0 = scmp.ge.s32.totalorder %s25_s20, 2  ;;  %p122_p1 = scmp.ne.s32.totalorder %s596_s14, %s592_s13 }
   0x7   : > { %p123_p2 = scmp.eq.s32.totalorder %s424_s18, 1  ;;  %p128_p3 = scmp.ne.s32.totalorder %s592_s13, %s588_s12 }
   0x8   : > { %s774_s20 = smov (%p26_p0, %s25_s20), 0  ;;  %p129_p5 = scmp.eq.s32.totalorder %s425_s19, 1 }
   0x9   : > { %p675_p4 = por %p123_p2, %p122_p1  ;;  %s107_s23 = ssub.s32 %s604_s16, %s774_s20 }
   0xa   : > { %p429_p6 = scmp.ge.s32.totalorder %s608_s17, 1  ;;  %p110_p7 = scmp.eq.s32.totalorder %s107_s23, 0 }
   0xb   : > { %p682_p8 = por %p129_p5, %p128_p3  ;;  %p172_p9 = scmp.lt.s32.totalorder %s608_s17, 3 }
   0xc   : > { %s688_s25 = scalar_select %p110_p7, %s596_s14, %s112_s21  }
   0xd   : > { %p173_p10 = pnand %p429_p6, %p172_p9 }
   0xe   : > { %v526_v0 = vld [vmem:[%s763_s1] sm:$0xff] (!%p173_p10)   ;;  %v610_v1 = vmov (!%p173_p10), 0.0   ;;  %v527_v2 = vld [vmem:[%s763_s1 + $0x8] sm:$0xff] (!%p173_p10)   ;;  %vm611_vm0 = vmmov (!%p173_p10), 0   ;;  %p206_p11 = scmp.lt.s32.totalorder (!%p173_p10), %s600_s15, 1  ;;  %v528_v3 = vld [vmem:[%s763_s1 + $0x10] sm:$0xff] (!%p173_p10)  }
   0xf   : > { %176 = sbr.rel (%p173_p10) target bundleno = 260 (0x104), region = 32  ;;  %457 = vmatprep.subr.bf16.mxu0 (!%p173_p10), %v610_v1  ;;  %463 = vmatprep.mubr.msk.bf16.mxu0 (!%p173_p10), %vm611_vm0, %v610_v1  ;;  %vm258_vm1 = vcmask (!%p173_p10), 392192   ;;  %s202_s10 = sand.u32 (!%p173_p10), 1, %s592_s13   ;;  %v450_v5 = vld [vmem:[%s764_s2] sm:$0xff] (!%p173_p10)   ;;  %vm311_vm2 = vcmask (!%p173_p10), 257024  }
  0x10   : > { %458 = vmatpush3.bf16.msra.mxu0 (!%p173_p10), %v526_v0  ;;  %s430_s19 = sshll.u32 (!%p173_p10), %s202_s10, 3  ;;  %v451_v6 = vunpack.c.l.bf16 (!%p173_p10), %v450_v5  ;;  %v452_v7 = vunpack.c.h.bf16 (!%p173_p10), %v450_v5  ;;  %s448_s26 = sshll.u32 (!%p173_p10), %s600_s15, 7 }
  0x11   : > { %459 = vmatprep.subr.bf16.mxu0 (!%p173_p10), %v610_v1  ;;  %s204_s21 = scalar_lea.vmem (!%p173_p10), [#allocation2], %s430_s19  ;;  %s714_s29 = scalar_lea.hbm (!%p173_p10), %s765_s3, %s448_s26 }
  0x12   : > { %s330_s23 = sshll.u32 (!%p173_p10), %s204_s21, 4  ;;  %s612_s4 = smov (!%p173_p10), [#allocation2]   ;;  %s709_s23 = int_to_ptr.vmem [resolvable:$true] %s330_s23 }
  0x13   : > { %s534_s5 = sshll.u32 (!%p173_p10), %s612_s4, 4  ;;  %s535_s5 = int_to_ptr.vmem [resolvable:$false] %s534_s5 }
  0x14   : > { %460 = vmatpush3.bf16.msra.mxu0 (!%p173_p10), %v527_v2  ;;  %p537_p1 = scmp.lt.s32.totalorder (!%p173_p10), %s709_s23, %s535_s5 }
  0x15   : > { %461 = vmatprep.subr.bf16.mxu0 (!%p173_p10), %v610_v1 }
  0x16   : > { %s207_s30 = scalar_select %p206_p11, %s600_s15, 1 }
  0x17   : > { %s530_s15 = scalar_lea.vmem %s709_s23, 128 }
  0x18   : > { %s445_s6 = sshll.u32 %s207_s30, 3  ;;  %462 = vmatpush3.bf16.msra.mxu0 %v528_v3  ;;  %s716_s30 = scalar_lea.sflag [#allocation3], %s202_s10 }
  0x19   : > { %s213_s9 = scalar_lea.vmem %s762_s0, %s445_s6  ;;  %p531_p12 = scmp.ne.s32.totalorder %s709_s23, %s530_s15 }
  0x1a   : > { %v529_v4 = vld [vmem:[%s213_s9] sm:$0xff]   ;;  %s536_s6 = scalar_lea.vmem %s535_s5, 256 }
  0x1b   : > { %464 = vmatmul.mubr.msk.bf16.vlgmr.msra.gmra.mrb[0].mxu0 %vm258_vm1, %v529_v4  ;;  %p532_p13 = pnand %p531_p12, %p675_p4  ;;  %p538_p2 = scmp.lt.s32.totalorder %s536_s6, %s530_s15 }
  0x1d   : > { %p533_p0 = pneg %p532_p13  ;;  %p539_p3 = por %p538_p2, %p537_p1 }
  0x1f   : > { %p540_p5 = pnand %p539_p3, %p533_p0 }
  0xee   : > { %v296_v8 = vpop.f32.mrb[0].mxu0 }
  0xef   : > { %v297_v9 = vadd.f32 %v451_v6, %v296_v8  ;;  %v465_v10 = vpop.f32.mrb[1].mxu0 }
  0xf0   : > { %v299_v11 = vpop.f32.mrb[2].mxu0 }
  0xf1   : > { %v446_v12 = vpack.c.bf16 %v297_v9, %v297_v9  ;;  %v300_v13 = vadd.f32 %v452_v7, %v299_v11  ;;  %v466_v14 = vpop.f32.mrb[3].mxu0 }
  0xf3   : > { %312 = vst.msk [vmem:[%s204_s21] sm:$0xf] %vm311_vm2, %v446_v12  ;;  %v447_v15 = vpack.c.bf16 %v300_v13, %v300_v13 }
  0xf5   : > { %313 = vst.msk [vmem:[%s204_s21 + $0x4] sm:$0xf] %vm311_vm2, %v447_v15 }
  0xf6   : > { %543 = shalt.err (!%p540_p5)
}
  0xf7   : > { %s544_s7 = scalar_lea.hbm %s714_s29, 128  ;;  %s548_s10 = scalar_lea.hbm %s765_s3, 256 }
  0xf8   : > { %p545_p6 = scmp.ne.s32.totalorder %s714_s29, %s544_s7  ;;  %p549_p10 = scmp.lt.u32.totalorder %s714_s29, %s765_s3 }
  0xf9   : > { %p550_p11 = scmp.lt.u32.totalorder %s548_s10, %s544_s7  ;;  %p552_p13 = scmp.lt.u32.totalorder %s544_s7, %s714_s29 }
  0xfa   : > { %p546_p7 = pnand %p545_p6, %p675_p4 }
  0xfb   : > { %p551_p12 = por %p550_p11, %p549_p10 }
  0xfc   : > { %p547_p9 = pneg %p546_p7 }
  0xfd   : > { %p553_p0 = por %p552_p13, %p551_p12 }
  0xff   : > { %p554_p1 = pnand %p553_p0, %p547_p9 }
 0x101   : > { %557 = shalt.err (!%p554_p1)
}
 0x102   : > { %s613_s19 = smov 64   ;;  %s614_s21 = smov 4  }
 0x103   : > { %467 = dma.vmem_to_hbm [thread:$0]  (%p675_p4), %s709_s23, 128, %s714_s29, %s716_s30, %s613_s19, %s613_s19, %s614_s21  }
 0x104 PF: > { %p473_p2 = scmp.ge.s32.totalorder %s608_s17, 2  ;;  %s345_s26 = sand.u32 1, %s588_s12  }
 0x105   : > { %s346_s27 = scalar_lea.sflag [#allocation3], %s345_s26 }
 0x106   : > { %p470_p3 = pnand %p473_p2, %p682_p8 }
 0x108   : > { %583 = dma.done.wait (!%p470_p3), %s346_s27, 128  }
 0x109   : > { %585 = vsyncadd (!%p470_p3), %s346_s27, 4294967168  ;;  %s16_s17 = sadd.s32 1, %s608_s17   ;;  %s768_s12 = smov %s592_s13 }
 0x10a   : > { %p13_p5 = scmp.ge.s32.totalorder %s16_s17, 4   ;;  %s769_s13 = smov %s596_s14 }
 0x10b   : > { %s770_s14 = smov %s688_s25  ;;  %s771_s15 = smov %s604_s16 }
 0x10c   : > { %s772_s16 = smov %s774_s20  ;;  %15 = sbr.rel (!%p13_p5) target bundleno = 4 (0x4), region = 70 }
 0x113   :  { %351 = vsyncpa [#allocation3], 1 }
 0x114   :  { %353 = vsyncpa [#allocation3 + $0x1], 1 }

</bundles_post_ra>
